<compile_context>
chip_gen: v7x
topology: tpu7x:2x2x1
jax: 0.10.0
libtpu: 0.0.40
codegen_flags: <defaults>
</compile_context>

<pallas_src>
import jax
import jax.numpy as jnp
from jax.experimental import pallas as pl
from jax.experimental.pallas import tpu as pltpu


def _round_up(x: int, m: int) -> int:
    return ((x + m - 1) // m) * m


def _vmem_budget():
    """Generation-aware budgets: (bytes for x buffers + f32 temps, vmem_limit)."""
    try:
        cap = pltpu.get_tpu_info().vmem_capacity_bytes
    except Exception:
        cap = 0
    if cap >= 100 * 1024 * 1024:                    # v5e / v6e: 128 MiB VMEM
        return 48 * 1024 * 1024, 64 * 1024 * 1024
    return 16 * 1024 * 1024, 32 * 1024 * 1024       # v7x (64 MiB/TC) or unknown


def _choose_tile_n(n: int, c: int, itemsize: int, x_budget: int) -> int:
    """Byte-driven sublane tile: ~2 MiB of logits per buffer, VMEM-bounded
    (counting f32 upcast temporaries), >=~8 grid steps when N allows."""
    bytes_per_row_dma = max(c * itemsize, 1)
    # Two double-buffered input tiles + ~3 f32-sized row temporaries
    # (x_f32 / shifted / exp+onehot) created by the in-kernel upcast.
    vmem_per_row = 2 * bytes_per_row_dma + 3 * c * 4
    vmem_rows = max(x_budget // vmem_per_row, 8)
    # ~2 MiB per tile amortizes the ~0.35 us/grid-step overhead (>=85% of HBM
    # roofline per measured tiled-copy data) without ballooning VMEM.
    target_rows = max((2 * 1024 * 1024) // bytes_per_row_dma, 32)
    # Keep >=~8 grid steps so DMA overlaps compute and v7x gets >=2 tiles/TC.
    steps_cap = _round_up(pl.cdiv(n, 8), 32)
    tile = min(vmem_rows, target_rows, steps_cap, _round_up(n, 8))
    if tile >= 32:
        tile = (tile // 32) * 32      # bf16 (16) / int8-fp8 (32) sublane packs
    else:
        tile = max((tile // 8) * 8, 8)
    return int(tile)


def _make_focal_kernel(gamma: float, tile_n: int, n_rows: int):
    def kernel(x_ref, tgt_ref, out_ref):
        x = x_ref[...].astype(jnp.float32)            # (TILE_N, C) f32 vregs
        tgt = tgt_ref[...]                            # (TILE_N, 1) int32

        # log-softmax pieces along the class (lane) axis; logp never built.
        m = jnp.max(x, axis=-1, keepdims=True)
        shifted = x - m
        lse = jnp.log(jnp.sum(jnp.exp(shifted), axis=-1, keepdims=True))

        # Gather shifted[target] via one-hot select + lane reduction.
        col_ids = jax.lax.broadcasted_iota(jnp.int32, x.shape, 1)
        onehot = col_ids == tgt
        s_t = jnp.sum(jnp.where(onehot, shifted, 0.0), axis=-1, keepdims=True)
        logpt = s_t - lse                             # (TILE_N, 1), <= 0

        if gamma == 0.0:
            # (1 - pt)**0 == 1 exactly (avoids 0*(-inf) NaN of the pow path).
            loss = -logpt
        else:
            pt = jnp.exp(logpt)                       # detached in torch; fwd identical
            base = jnp.maximum(1.0 - pt, 0.0)         # guard tiny negatives
            if float(gamma).is_integer() and 0.0 < gamma <= 8.0:
                w = base                              # repeated VPU multiplies
                for _ in range(int(gamma) - 1):
                    w = w * base
            else:
                w = jnp.power(base, gamma)            # non-integer gamma only
            loss = -(w * logpt)

        # Mask rows past N (ragged final tile) BEFORE the in-tile reduction so
        # garbage rows (possibly NaN/Inf) cannot leak into the partial sum.
        row0 = pl.program_id(0) * tile_n
        rows = row0 + jax.lax.broadcasted_iota(jnp.int32, (tile_n, 1), 0)
        masked = jnp.where(rows < n_rows, loss, 0.0)

        # Per-tile partial sum written once into sublane 0 of an (8,1) block
        # (tiny output: 32 B/tile instead of a lane-sparse (N,1) round-trip).
        partial = jnp.sum(masked, axis=0, keepdims=True)      # (1, 1)
        sub = jax.lax.broadcasted_iota(jnp.int32, (8, 1), 0)
        out_ref[...] = jnp.where(sub == 0, partial, 0.0)

    return kernel


def focal_loss(x, target, gamma: float = 0.0, alpha: float = 1.0, tile_n=None):
    """x: (N, C) logits (any float dtype); target: (N,) int class ids.
    Returns scalar f32 = mean(alpha * (-(1-pt)**gamma * logpt))."""
    n, c = x.shape
    itemsize = jnp.dtype(x.dtype).itemsize
    x_budget, vmem_limit = _vmem_budget()
    if tile_n is None:
        tile_n = _choose_tile_n(n, c, itemsize, x_budget)
    tile_n = int(tile_n)
    num_tiles = int(pl.cdiv(n, tile_n))
    tgt2d = target.reshape(n, 1).astype(jnp.int32)

    cost = pl.CostEstimate(
        flops=6 * n * c,
        transcendentals=n * c + 2 * n,
        bytes_accessed=n * c * itemsize + n * 4 + num_tiles * 8 * 4,
    )

    # NOTE: if profiles for huge-C shapes (tile_n forced small) still show
    # exposed DMA, add pipeline_mode=pl.Buffered(3) to the logits BlockSpec
    # after re-checking the VMEM budget (matters most on v7x's 64 MiB VMEM).
    per_tile = pl.pallas_call(
        _make_focal_kernel(float(gamma), tile_n, int(n)),
        out_shape=jax.ShapeDtypeStruct((num_tiles * 8, 1), jnp.float32),
        grid=(num_tiles,),
        in_specs=[
            pl.BlockSpec((tile_n, c), lambda i: (i, 0)),   # logits tile
            pl.BlockSpec((tile_n, 1), lambda i: (i, 0)),   # target tile
        ],
        out_specs=pl.BlockSpec((8, 1), lambda i: (i, 0)),  # per-tile partial sum
        compiler_params=pltpu.CompilerParams(
            dimension_semantics=("parallel",),             # megacore-friendly on v7x
            vmem_limit_bytes=vmem_limit,
        ),
        cost_estimate=cost,
    )(x, tgt2d)

    # Tiny epilogue in XLA over num_tiles partial sums.
    return alpha * (jnp.sum(per_tile) / n)


def _focal_loss_ref(x, target, gamma=0.0, alpha=1.0):
    logp = jax.nn.log_softmax(x.astype(jnp.float32), axis=-1)
    logpt = jnp.take_along_axis(logp, target[:, None].astype(jnp.int32), axis=-1)
    pt = jnp.exp(logpt)
    loss = -1.0 * (1.0 - pt) ** gamma * logpt
    return jnp.mean(alpha * loss)


if __name__ == "__main__":
    root = jax.random.PRNGKey(0)
    kx, kt, kx2, kt2 = jax.random.split(root, 4)

    # 1) Small shape, focal term active (gamma=2, alpha=0.25).
    N, C = 8, 32
    x = jax.random.normal(kx, (N, C), dtype=jnp.float32)
    target = jax.random.randint(kt, (N,), 0, C, dtype=jnp.int32)
    out = jax.block_until_ready(focal_loss(x, target, gamma=2.0, alpha=0.25))
    ref = _focal_loss_ref(x, target, gamma=2.0, alpha=0.25)
    assert jnp.allclose(out, ref, rtol=1e-5, atol=1e-6), (out, ref)

    # 2) Module defaults (gamma=0, alpha=1.0) — exercises the no-weight path.
    out0 = jax.block_until_ready(focal_loss(x, target, gamma=0.0, alpha=1.0))
    ref0 = _focal_loss_ref(x, target, gamma=0.0, alpha=1.0)
    assert jnp.allclose(out0, ref0, rtol=1e-5, atol=1e-6), (out0, ref0)

    # 3) Multi-tile grid with a ragged final tile (N % TILE_N != 0).
    N2, C2 = 100, 32
    x2 = jax.random.normal(kx2, (N2, C2), dtype=jnp.float32)
    target2 = jax.random.randint(kt2, (N2,), 0, C2, dtype=jnp.int32)
    out2 = jax.block_until_ready(focal_loss(x2, target2, gamma=2.0, alpha=0.25, tile_n=32))
    ref2 = _focal_loss_ref(x2, target2, gamma=2.0, alpha=0.25)
    assert jnp.allclose(out2, ref2, rtol=1e-5, atol=1e-6), (out2, ref2)

    # 4) Large integer gamma (repeated-multiply fast path) vs jnp.power ref.
    out8 = jax.block_until_ready(focal_loss(x2, target2, gamma=8.0, alpha=1.0))
    ref8 = _focal_loss_ref(x2, target2, gamma=8.0, alpha=1.0)
    assert jnp.allclose(out8, ref8, rtol=1e-5, atol=1e-5), (out8, ref8)

    # 5) bf16 logits — exercises the in-kernel upcast (no wrapper upcast).
    xb = x2.astype(jnp.bfloat16)
    outb = jax.block_until_ready(focal_loss(xb, target2, gamma=2.0, alpha=0.25))
    refb = _focal_loss_ref(xb, target2, gamma=2.0, alpha=0.25)
    assert jnp.allclose(outb, refb, rtol=1e-4, atol=1e-5), (outb, refb)

    print("KERNEL_OK")
</pallas_src>

<mosaic_0001>
module attributes {stable_mosaic.version = 11 : i64} {
  func.func @kernel(%arg0: i32, %arg1: memref<8x32xf32, #tpu.memory_space<vmem>>, %arg2: memref<8x1xi32, #tpu.memory_space<vmem>>, %arg3: memref<8x1xf32, #tpu.memory_space<vmem>>) attributes {dimension_semantics = [#tpu.dimension_semantics<parallel>], iteration_bounds = array<i64: 1>, scalar_prefetch = 0 : i64, scratch_operands = 0 : i64, tpu.core_type = #tpu.core_type<tc>, window_params = [{transform_indices = @transform_0, window_bounds = array<i64: 8, 32>}, {transform_indices = @transform_1, window_bounds = array<i64: 8, 1>}, {transform_indices = @transform_2, window_bounds = array<i64: 8, 1>}]} {
    %c0 = arith.constant 0 : index
    %c0_0 = arith.constant 0 : index
    %0 = vector.load %arg1[%c0, %c0_0] : memref<8x32xf32, #tpu.memory_space<vmem>>, vector<8x32xf32>
    %c0_1 = arith.constant 0 : index
    %c0_2 = arith.constant 0 : index
    %1 = vector.load %arg2[%c0_1, %c0_2] : memref<8x1xi32, #tpu.memory_space<vmem>>, vector<8x1xi32>
    %cst = arith.constant dense<0xFF800000> : vector<8xf32>
    %2 = vector.multi_reduction <maximumf>, %0, %cst [1] : vector<8x32xf32> to vector<8xf32>
    %3 = vector.shape_cast %2 : vector<8xf32> to vector<8x1xf32>
    %4 = vector.broadcast %3 : vector<8x1xf32> to vector<8x32xf32>
    %5 = arith.subf %0, %4 : vector<8x32xf32>
    %6 = math.exp %5 : vector<8x32xf32>
    %cst_3 = arith.constant dense<0.000000e+00> : vector<8xf32>
    %7 = vector.multi_reduction <add>, %6, %cst_3 [1] : vector<8x32xf32> to vector<8xf32>
    %8 = vector.shape_cast %7 : vector<8xf32> to vector<8x1xf32>
    %9 = math.log %8 : vector<8x1xf32>
    %10 = tpu.iota {dimensions = array<i32: 1>} : vector<8x32xi32>
    %11 = vector.broadcast %1 : vector<8x1xi32> to vector<8x32xi32>
    %12 = arith.cmpi eq, %10, %11 : vector<8x32xi32>
    %cst_4 = arith.constant 0.000000e+00 : f32
    %13 = vector.broadcast %cst_4 : f32 to vector<8x32xf32>
    %14 = arith.select %12, %5, %13 : vector<8x32xi1>, vector<8x32xf32>
    %cst_5 = arith.constant dense<0.000000e+00> : vector<8xf32>
    %15 = vector.multi_reduction <add>, %14, %cst_5 [1] : vector<8x32xf32> to vector<8xf32>
    %16 = vector.shape_cast %15 : vector<8xf32> to vector<8x1xf32>
    %17 = arith.subf %16, %9 : vector<8x1xf32>
    %18 = math.exp %17 : vector<8x1xf32>
    %cst_6 = arith.constant 1.000000e+00 : f32
    %19 = vector.broadcast %cst_6 : f32 to vector<8x1xf32>
    %20 = arith.subf %19, %18 : vector<8x1xf32>
    %cst_7 = arith.constant 0.000000e+00 : f32
    %21 = vector.broadcast %cst_7 : f32 to vector<8x1xf32>
    %22 = arith.maximumf %20, %21 : vector<8x1xf32>
    %23 = arith.mulf %22, %22 : vector<8x1xf32>
    %24 = arith.mulf %23, %17 : vector<8x1xf32>
    %cst_8 = arith.constant 0.000000e+00 : f32
    %25 = vector.broadcast %cst_8 : f32 to vector<8x1xf32>
    %26 = arith.subf %25, %24 : vector<8x1xf32>
    %c8_i32 = arith.constant 8 : i32
    %27 = arith.muli %arg0, %c8_i32 : i32
    %28 = tpu.iota {dimensions = array<i32: 0>} : vector<8x1xi32>
    %29 = vector.broadcast %27 : i32 to vector<8x1xi32>
    %30 = arith.addi %29, %28 : vector<8x1xi32>
    %c8_i32_9 = arith.constant 8 : i32
    %31 = vector.broadcast %c8_i32_9 : i32 to vector<8x1xi32>
    %32 = arith.cmpi slt, %30, %31 : vector<8x1xi32>
    %cst_10 = arith.constant 0.000000e+00 : f32
    %33 = vector.broadcast %cst_10 : f32 to vector<8x1xf32>
    %34 = arith.select %32, %26, %33 : vector<8x1xi1>, vector<8x1xf32>
    %cst_11 = arith.constant dense<0.000000e+00> : vector<1xf32>
    %35 = vector.multi_reduction <add>, %34, %cst_11 [0] : vector<8x1xf32> to vector<1xf32>
    %36 = vector.shape_cast %35 : vector<1xf32> to vector<1x1xf32>
    %37 = tpu.iota {dimensions = array<i32: 0>} : vector<8x1xi32>
    %c0_i32 = arith.constant 0 : i32
    %38 = vector.broadcast %c0_i32 : i32 to vector<8x1xi32>
    %39 = arith.cmpi eq, %37, %38 : vector<8x1xi32>
    %cst_12 = arith.constant 0.000000e+00 : f32
    %40 = vector.shape_cast %36 : vector<1x1xf32> to vector<1x1xf32>
    %41 = vector.broadcast %40 : vector<1x1xf32> to vector<8x1xf32>
    %42 = vector.broadcast %cst_12 : f32 to vector<8x1xf32>
    %43 = arith.select %39, %41, %42 : vector<8x1xi1>, vector<8x1xf32>
    %c0_13 = arith.constant 0 : index
    %c0_14 = arith.constant 0 : index
    %44 = vector.load %arg3[%c0_13, %c0_14] : memref<8x1xf32, #tpu.memory_space<vmem>>, vector<8x1xf32>
    tpu.vector_store %arg3[%c0_13, %c0_14], %43 {strides = array<i32>} : memref<8x1xf32, #tpu.memory_space<vmem>>, vector<8x1xf32>,
    return
  }
  func.func @transform_0(%arg0: i32) -> (i32, i32) {
    %c0_i32 = arith.constant 0 : i32
    %c0_i32_0 = arith.constant 0 : i32
    return %arg0, %c0_i32 : i32, i32
  }
  func.func @transform_1(%arg0: i32) -> (i32, i32) {
    %c0_i32 = arith.constant 0 : i32
    %c0_i32_0 = arith.constant 0 : i32
    return %arg0, %c0_i32 : i32, i32
  }
  func.func @transform_2(%arg0: i32) -> (i32, i32) {
    %c0_i32 = arith.constant 0 : i32
    %c0_i32_0 = arith.constant 0 : i32
    return %arg0, %c0_i32 : i32, i32
  }
}

</mosaic_0001>

<bundles_post_ra>
// kernel: tpu_custom_call.1
= control target key start
LH: loop header
LB: loop body
LE: loop exit
PB: predicated region body
PF: predicated region fallthrough
CT: control target
= control target key end

     0   :  { %vm13_vm0 = vcmask 261120   ;;  %v72_v1 = vmov 0   ;;  %v25_v7 = vlaneseq  ;;  %vm58_vm3 = vcmask 7168   ;;  %s100_s0 = inlined_call_operand.vmem [shape: f32[8,32], index: 0, kind: input, shape index: {}]   ;;  %s101_s1 = inlined_call_operand.vmem [shape: s32[8,1], index: 1, kind: input, shape index: {}]   ;;  %s102_s2 = inlined_call_operand.vmem [shape: f32[8,1], index: 2, kind: output, shape index: {}]  }
   0x1   :  { %v11_v0 = vld [vmem:[%s100_s0] sm:$0xff]  ;;  %65 = vset.pattern.permute.xlu0 %v72_v1 }
   0x2   :  { %v14_v2 = vsel %vm13_vm0, %v11_v0, -inf  ;;  %v12_v3 = vld [vmem:[%s101_s1] sm:$0xff]  ;;  %v26_v8 = vand.u32 127, %v25_v7  ;;  %v45_v29 = vshrl.u32 %v25_v7, 7 }
   0x3   :  { %15 = vmax.xlane.f32.xlu0 %v14_v2 }
   0x4   :  { %vm56_vm2 = vcmp.eq.s32.totalorder %v45_v29, 0 }
  0x19   :  { %28 = vperm.xlu0 %65, %v12_v3  }
  0x90   :  { %v16_v4 = vpop.xlane.xlu0 %15 }
  0x91   :  { %v17_v5 = vsub.f32 %v11_v0, %v16_v4 }
  0x93   :  { %v18_v6 = vmul.f32 1.442695, %v17_v5 }
  0x95   :  { %66 = vpow2.f32 %v18_v6 }
  0x98   :  { %v29_v9 = vpop.permute.xlu0 %28 }
  0x99   :  { %vm30_vm1 = vcmp.eq.s32.totalorder %v26_v8, %v29_v9 }
  0x9a   :  { %v31_v12 = vsel %vm30_vm1, %v17_v5, 0.0 }
  0x9b   :  { %v32_v13 = vsel %vm13_vm0, %v31_v12, 0.0 }
  0x9f   :  { %v67_v10 = vpop.eup %66 }
  0xa0   :  { %v20_v11 = vsel %vm13_vm0, %v67_v10, 0.0 }
  0xa1   :  { %21 = vadd.xlane.f32.xlu1 %v20_v11 }
  0xa5   :  { %33 = vadd.xlane.f32.xlu1 %v32_v13 }
 0x12e   :  { %v22_v14 = vpop.xlane.xlu1 %21 }
 0x12f   :  { %68 = vlog2.f32 %v22_v14 }
 0x132   :  { %v34_v17 = vpop.xlane.xlu1 %33 }
 0x139   :  { %v69_v15 = vpop.eup %68 }
 0x13a   :  { %v24_v16 = vmul.f32 0.6931472, %v69_v15 }
 0x13c   :  { %v35_v18 = vsub.f32 %v34_v17, %v24_v16 }
 0x13e   :  { %v36_v19 = vmul.f32 1.442695, %v35_v18 }
 0x140   :  { %70 = vpow2.f32 %v36_v19 }
 0x14a   :  { %v71_v20 = vpop.eup %70 }
 0x14b   :  { %v38_v21 = vsub.f32 1.0, %v71_v20 }
 0x14d   :  { %v39_v22 = vmax.f32 %v38_v21, 0.0 }
 0x14f   :  { %v40_v23 = vmul.f32 %v39_v22, %v39_v22 }
 0x151   :  { %v41_v24 = vmul.f32 %v40_v23, %v35_v18 }
 0x153   :  { %v42_v25 = vsub.f32 0.0, %v41_v24 }
 0x155   :  { %v50_v26 = vrot.slane %v42_v25, 4 }
 0x157   :  { %v51_v27 = vadd.f32 %v50_v26, %v42_v25 }
 0x159   :  { %v52_v28 = vrot.slane %v51_v27, 2 }
 0x15b   :  { %v53_v30 = vadd.f32 %v52_v28, %v51_v27 }
 0x15d   :  { %v54_v31 = vrot.slane %v53_v30, 1 }
 0x15f   :  { %v55_v32 = vadd.f32 %v54_v31, %v53_v30 }
 0x161   :  { %v57_v33 = vsel %vm56_vm2, %v55_v32, 0.0 }
 0x162   :  { %59 = vst.msk [vmem:[%s102_s2] sm:$0xff] %vm58_vm3, %v57_v33 }

</bundles_post_ra>
